<compile_context>
chip_gen: v5e
topology: v5e:2x2
jax: 0.10.0
libtpu: 0.0.40
codegen_flags: <defaults>
</compile_context>

<pallas_src>
import functools

import jax
import jax.numpy as jnp
from jax.experimental import pallas as pl
from jax.experimental.pallas import tpu as pltpu


def _round_up(a, b):
    return -(-a // b) * b


# ----------------------------------------------------------------------------
# Kernels
# ----------------------------------------------------------------------------
def _circular_pad_kernel_w_last(x_ref, o_ref, *, pad):
    """W is the lane dim.  x_ref: (blk, H, W), o_ref: (blk, Ho, Wo)."""
    p_l, p_r, p_t, p_b = pad
    _, H, W = x_ref.shape

    # 128-lane-aligned interior of the body columns (dest cols [p_l, p_l+W)).
    a0 = _round_up(p_l, 128)
    a1 = ((p_l + W) // 128) * 128
    split = (p_l % 128 != 0) and (a1 - a0 >= 128)

    def write_band(dst_rows, src_rows):
        if split:
            # Unmasked, lane-aligned interior store (rotate happens on the
            # source side only); keeps the bulk copy off masked vst.msk.
            o_ref[:, dst_rows, a0:a1] = x_ref[:, src_rows, a0 - p_l:a1 - p_l]
            # Narrow masked edge stores.
            o_ref[:, dst_rows, p_l:a0] = x_ref[:, src_rows, 0:a0 - p_l]
            if p_l + W > a1:
                o_ref[:, dst_rows, a1:p_l + W] = x_ref[:, src_rows, a1 - p_l:W]
        else:
            o_ref[:, dst_rows, p_l:p_l + W] = x_ref[:, src_rows, :]
        # Left halo columns wrap from the right edge of x.
        if p_l:
            o_ref[:, dst_rows, 0:p_l] = x_ref[:, src_rows, W - p_l:]
        # Right halo columns wrap from the left edge of x.
        if p_r:
            o_ref[:, dst_rows, p_l + W:] = x_ref[:, src_rows, 0:p_r]

    # Body rows, then top/bottom halo rows (W-wrap re-applied per band).
    write_band(slice(p_t, p_t + H), slice(0, H))
    if p_t:
        write_band(slice(0, p_t), slice(H - p_t, H))
    if p_b:
        write_band(slice(p_t + H, p_t + H + p_b), slice(0, p_b))


def _circular_pad_kernel_nc_last(x_ref, o_ref, *, pad):
    """Lane-dense layout: NC is the lane dim.  x_ref: (H, W, blk), o_ref: (Ho, Wo, blk)."""
    p_l, p_r, p_t, p_b = pad
    H, W, _ = x_ref.shape

    def write_band(dst_rows, src_rows):
        # All stores below are full-width along the lane (NC) dim.
        o_ref[dst_rows, p_l:p_l + W, :] = x_ref[src_rows, :, :]
        if p_l:
            o_ref[dst_rows, 0:p_l, :] = x_ref[src_rows, W - p_l:, :]
        if p_r:
            o_ref[dst_rows, p_l + W:, :] = x_ref[src_rows, 0:p_r, :]

    write_band(slice(p_t, p_t + H), slice(0, H))
    if p_t:
        write_band(slice(0, p_t), slice(H - p_t, H))
    if p_b:
        write_band(slice(p_t + H, p_t + H + p_b), slice(0, p_b))


# ----------------------------------------------------------------------------
# Wrapper
# ----------------------------------------------------------------------------
def circular_pad(x, pad, *, vmem_budget_bytes=12 << 20, vmem_limit_bytes=32 << 20):
    """Pallas equivalent of torch.nn.functional.pad(x, pad, mode='circular').

    x   : (N, C, H, W), or (N, C, W) with a 2-length pad.
    pad : (left, right) pads W only, or (left, right, top, bottom) pads W and H.

    vmem_budget_bytes: target for the double-buffered, tile-padded (in + out)
    block footprint.  12 MiB is safe under every generation's default scoped
    VMEM limit (16 MiB v5e / 32 MiB v6e,v7x); can be raised to ~24-28 MiB on
    v6e for very large inputs.
    """
    pad = tuple(int(p) for p in pad)
    if any(p < 0 for p in pad):
        raise ValueError("circular_pad: negative pad values are not supported")

    squeeze_h = False
    if x.ndim == 3:
        if len(pad) != 2:
            raise ValueError("3-D input requires a 2-length pad (W only)")
        x = x[:, :, None, :]
        squeeze_h = True
    elif x.ndim != 4:
        raise ValueError("circular_pad supports 3-D or 4-D inputs only")
    if len(pad) == 2:
        pad = (pad[0], pad[1], 0, 0)
    if len(pad) != 4:
        raise ValueError("only 1D/2D circular pad supported")
    p_l, p_r, p_t, p_b = pad

    N, C, H, W = x.shape
    if p_l > W or p_r > W or p_t > H or p_b > H:
        raise ValueError("circular pad amount must not exceed the corresponding dim")

    Ho, Wo = H + p_t + p_b, W + p_l + p_r
    NC = N * C

    itemsize = jnp.dtype(x.dtype).itemsize
    sub = max(8, 32 // itemsize)  # sublane packing: 8 f32, 16 bf16, 32 int8

    in_bytes = NC * H * W * itemsize
    out_bytes = NC * Ho * Wo * itemsize
    cost = pl.CostEstimate(flops=0, transcendentals=0,
                           bytes_accessed=in_bytes + out_bytes)
    cparams = pltpu.CompilerParams(dimension_semantics=("parallel",),
                                   vmem_limit_bytes=vmem_limit_bytes)

    # Tile-padded footprint of one 128-lane group in the lane-dense layout.
    nc_last_per128 = (H * _round_up(W, sub) + Ho * _round_up(Wo, sub)) * 128 * itemsize
    # Lane-dense path pays off when the padded W is lane-sparse and the folded
    # NC axis is the larger one (and one 128-lane slab fits the budget).
    use_nc_last = (Wo < 128) and (NC > Wo) and (2 * nc_last_per128 <= vmem_budget_bytes)

    if use_nc_last:
        x2 = jnp.transpose(x, (2, 3, 0, 1)).reshape(H, W, NC)
        if NC <= 128:
            blk = NC  # lane dim equals the full array dim
        else:
            groups_total = pl.cdiv(NC, 128)
            groups = max(1, vmem_budget_bytes // (2 * nc_last_per128))
            groups = min(groups, groups_total)
            if groups_total >= 2:  # keep >= 2 grid steps (v7x megacore / pipelining)
                groups = min(groups, pl.cdiv(groups_total, 2))
            blk = 128 * groups
        grid = (pl.cdiv(NC, blk),)
        kernel = functools.partial(_circular_pad_kernel_nc_last, pad=pad)
        out2 = pl.pallas_call(
            kernel,
            out_shape=jax.ShapeDtypeStruct((Ho, Wo, NC), x.dtype),
            grid=grid,
            in_specs=[pl.BlockSpec((H, W, blk), lambda i: (0, 0, i))],
            out_specs=pl.BlockSpec((Ho, Wo, blk), lambda i: (0, 0, i)),
            compiler_params=cparams,
            cost_estimate=cost,
        )(x2)
        out = jnp.transpose(out2.reshape(Ho, Wo, N, C), (2, 3, 0, 1))
    else:
        x2 = x.reshape(NC, H, W)
        # Tile-padded per-NC-row footprint (in + out), double-buffered.
        per_row = (_round_up(H, sub) * _round_up(W, 128)
                   + _round_up(Ho, sub) * _round_up(Wo, 128)) * itemsize
        blk = max(1, min(NC, vmem_budget_bytes // (2 * per_row)))
        if NC >= 2:  # keep >= 2 grid steps when NC permits (v7x megacore)
            blk = min(blk, pl.cdiv(NC, 2))
        grid = (pl.cdiv(NC, blk),)
        kernel = functools.partial(_circular_pad_kernel_w_last, pad=pad)
        out2 = pl.pallas_call(
            kernel,
            out_shape=jax.ShapeDtypeStruct((NC, Ho, Wo), x.dtype),
            grid=grid,
            in_specs=[pl.BlockSpec((blk, H, W), lambda i: (i, 0, 0))],
            out_specs=pl.BlockSpec((blk, Ho, Wo), lambda i: (i, 0, 0)),
            compiler_params=cparams,
            cost_estimate=cost,
        )(x2)
        out = out2.reshape(N, C, Ho, Wo)

    if squeeze_h:
        out = out[:, :, 0, :]
    return out


if __name__ == "__main__":
    keys = jax.random.split(jax.random.PRNGKey(0), 4)

    # 1) WENO-style small NCHW input (W-last path, tiny NC).
    x = jax.random.normal(keys[0], (2, 4, 16, 16), dtype=jnp.float32)
    pad = (2, 2, 2, 2)  # (left, right, top, bottom)
    out = jax.block_until_ready(circular_pad(x, pad))
    ref = jnp.pad(x, ((0, 0), (0, 0), (pad[2], pad[3]), (pad[0], pad[1])),
                  mode="wrap")
    assert out.shape == ref.shape, (out.shape, ref.shape)
    assert jnp.array_equal(out, ref), "mismatch vs reference 2D circular pad"

    # 2) Lane-dense (NC-last) path: folded N*C axis >= padded W.
    x_big_c = jax.random.normal(keys[1], (2, 64, 16, 16), dtype=jnp.float32)
    out2 = jax.block_until_ready(circular_pad(x_big_c, pad))
    ref2 = jnp.pad(x_big_c, ((0, 0), (0, 0), (pad[2], pad[3]), (pad[0], pad[1])),
                   mode="wrap")
    assert jnp.array_equal(out2, ref2), "mismatch vs reference (lane-dense path)"

    # 3) Large-W W-last path with 128-lane-aligned interior split stores.
    x_wide = jax.random.normal(keys[2], (1, 2, 8, 256), dtype=jnp.float32)
    out3 = jax.block_until_ready(circular_pad(x_wide, (3, 2)))
    ref3 = jnp.pad(x_wide, ((0, 0), (0, 0), (0, 0), (3, 2)), mode="wrap")
    assert jnp.array_equal(out3, ref3), "mismatch vs reference (wide-W path)"

    # 4) 3-D input, W-only circular pad.
    x_1d = jax.random.normal(keys[3], (2, 4, 16), dtype=jnp.float32)
    out4 = jax.block_until_ready(circular_pad(x_1d, (3, 1)))
    ref4 = jnp.pad(x_1d, ((0, 0), (0, 0), (3, 1)), mode="wrap")
    assert jnp.array_equal(out4, ref4), "mismatch vs reference 1D circular pad"

    print("KERNEL_OK")
</pallas_src>

<mosaic_0001>
module attributes {stable_mosaic.version = 11 : i64} {
  func.func @_circular_pad_kernel_w_last(%arg0: i32, %arg1: memref<4x16x16xf32, #tpu.memory_space<vmem>>, %arg2: memref<4x20x20xf32, #tpu.memory_space<vmem>>) attributes {dimension_semantics = [#tpu.dimension_semantics<parallel>], iteration_bounds = array<i64: 2>, scalar_prefetch = 0 : i64, scratch_operands = 0 : i64, tpu.core_type = #tpu.core_type<tc>, window_params = [{transform_indices = @transform_0, window_bounds = array<i64: 4, 16, 16>}, {transform_indices = @transform_1, window_bounds = array<i64: 4, 20, 20>}]} {
    %c0 = arith.constant 0 : index
    %c0_0 = arith.constant 0 : index
    %c0_1 = arith.constant 0 : index
    %0 = vector.load %arg1[%c0, %c0_0, %c0_1] : memref<4x16x16xf32, #tpu.memory_space<vmem>>, vector<4x16x16xf32>
    %c0_2 = arith.constant 0 : index
    %c2 = arith.constant 2 : index
    %c2_3 = arith.constant 2 : index
    %1 = vector.load %arg2[%c0_2, %c2, %c2_3] : memref<4x20x20xf32, #tpu.memory_space<vmem>>, vector<4x16x16xf32>
    tpu.vector_store %arg2[%c0_2, %c2, %c2_3], %0 {strides = array<i32>} : memref<4x20x20xf32, #tpu.memory_space<vmem>>, vector<4x16x16xf32>,
    %c0_4 = arith.constant 0 : index
    %c0_5 = arith.constant 0 : index
    %c14 = arith.constant 14 : index
    %2 = vector.load %arg1[%c0_4, %c0_5, %c14] : memref<4x16x16xf32, #tpu.memory_space<vmem>>, vector<4x16x2xf32>
    %c0_6 = arith.constant 0 : index
    %c2_7 = arith.constant 2 : index
    %c0_8 = arith.constant 0 : index
    %3 = vector.load %arg2[%c0_6, %c2_7, %c0_8] : memref<4x20x20xf32, #tpu.memory_space<vmem>>, vector<4x16x2xf32>
    tpu.vector_store %arg2[%c0_6, %c2_7, %c0_8], %2 {strides = array<i32>} : memref<4x20x20xf32, #tpu.memory_space<vmem>>, vector<4x16x2xf32>,
    %c0_9 = arith.constant 0 : index
    %c0_10 = arith.constant 0 : index
    %c0_11 = arith.constant 0 : index
    %4 = vector.load %arg1[%c0_9, %c0_10, %c0_11] : memref<4x16x16xf32, #tpu.memory_space<vmem>>, vector<4x16x2xf32>
    %c0_12 = arith.constant 0 : index
    %c2_13 = arith.constant 2 : index
    %c18 = arith.constant 18 : index
    %5 = vector.load %arg2[%c0_12, %c2_13, %c18] : memref<4x20x20xf32, #tpu.memory_space<vmem>>, vector<4x16x2xf32>
    tpu.vector_store %arg2[%c0_12, %c2_13, %c18], %4 {strides = array<i32>} : memref<4x20x20xf32, #tpu.memory_space<vmem>>, vector<4x16x2xf32>,
    %c0_14 = arith.constant 0 : index
    %c14_15 = arith.constant 14 : index
    %c0_16 = arith.constant 0 : index
    %6 = vector.load %arg1[%c0_14, %c14_15, %c0_16] : memref<4x16x16xf32, #tpu.memory_space<vmem>>, vector<4x2x16xf32>
    %c0_17 = arith.constant 0 : index
    %c0_18 = arith.constant 0 : index
    %c2_19 = arith.constant 2 : index
    %7 = vector.load %arg2[%c0_17, %c0_18, %c2_19] : memref<4x20x20xf32, #tpu.memory_space<vmem>>, vector<4x2x16xf32>
    tpu.vector_store %arg2[%c0_17, %c0_18, %c2_19], %6 {strides = array<i32>} : memref<4x20x20xf32, #tpu.memory_space<vmem>>, vector<4x2x16xf32>,
    %c0_20 = arith.constant 0 : index
    %c14_21 = arith.constant 14 : index
    %c14_22 = arith.constant 14 : index
    %8 = vector.load %arg1[%c0_20, %c14_21, %c14_22] : memref<4x16x16xf32, #tpu.memory_space<vmem>>, vector<4x2x2xf32>
    %c0_23 = arith.constant 0 : index
    %c0_24 = arith.constant 0 : index
    %c0_25 = arith.constant 0 : index
    %9 = vector.load %arg2[%c0_23, %c0_24, %c0_25] : memref<4x20x20xf32, #tpu.memory_space<vmem>>, vector<4x2x2xf32>
    tpu.vector_store %arg2[%c0_23, %c0_24, %c0_25], %8 {strides = array<i32>} : memref<4x20x20xf32, #tpu.memory_space<vmem>>, vector<4x2x2xf32>,
    %c0_26 = arith.constant 0 : index
    %c14_27 = arith.constant 14 : index
    %c0_28 = arith.constant 0 : index
    %10 = vector.load %arg1[%c0_26, %c14_27, %c0_28] : memref<4x16x16xf32, #tpu.memory_space<vmem>>, vector<4x2x2xf32>
    %c0_29 = arith.constant 0 : index
    %c0_30 = arith.constant 0 : index
    %c18_31 = arith.constant 18 : index
    %11 = vector.load %arg2[%c0_29, %c0_30, %c18_31] : memref<4x20x20xf32, #tpu.memory_space<vmem>>, vector<4x2x2xf32>
    tpu.vector_store %arg2[%c0_29, %c0_30, %c18_31], %10 {strides = array<i32>} : memref<4x20x20xf32, #tpu.memory_space<vmem>>, vector<4x2x2xf32>,
    %c0_32 = arith.constant 0 : index
    %c0_33 = arith.constant 0 : index
    %c0_34 = arith.constant 0 : index
    %12 = vector.load %arg1[%c0_32, %c0_33, %c0_34] : memref<4x16x16xf32, #tpu.memory_space<vmem>>, vector<4x2x16xf32>
    %c0_35 = arith.constant 0 : index
    %c18_36 = arith.constant 18 : index
    %c2_37 = arith.constant 2 : index
    %13 = vector.load %arg2[%c0_35, %c18_36, %c2_37] : memref<4x20x20xf32, #tpu.memory_space<vmem>>, vector<4x2x16xf32>
    tpu.vector_store %arg2[%c0_35, %c18_36, %c2_37], %12 {strides = array<i32>} : memref<4x20x20xf32, #tpu.memory_space<vmem>>, vector<4x2x16xf32>,
    %c0_38 = arith.constant 0 : index
    %c0_39 = arith.constant 0 : index
    %c14_40 = arith.constant 14 : index
    %14 = vector.load %arg1[%c0_38, %c0_39, %c14_40] : memref<4x16x16xf32, #tpu.memory_space<vmem>>, vector<4x2x2xf32>
    %c0_41 = arith.constant 0 : index
    %c18_42 = arith.constant 18 : index
    %c0_43 = arith.constant 0 : index
    %15 = vector.load %arg2[%c0_41, %c18_42, %c0_43] : memref<4x20x20xf32, #tpu.memory_space<vmem>>, vector<4x2x2xf32>
    tpu.vector_store %arg2[%c0_41, %c18_42, %c0_43], %14 {strides = array<i32>} : memref<4x20x20xf32, #tpu.memory_space<vmem>>, vector<4x2x2xf32>,
    %c0_44 = arith.constant 0 : index
    %c0_45 = arith.constant 0 : index
    %c0_46 = arith.constant 0 : index
    %16 = vector.load %arg1[%c0_44, %c0_45, %c0_46] : memref<4x16x16xf32, #tpu.memory_space<vmem>>, vector<4x2x2xf32>
    %c0_47 = arith.constant 0 : index
    %c18_48 = arith.constant 18 : index
    %c18_49 = arith.constant 18 : index
    %17 = vector.load %arg2[%c0_47, %c18_48, %c18_49] : memref<4x20x20xf32, #tpu.memory_space<vmem>>, vector<4x2x2xf32>
    tpu.vector_store %arg2[%c0_47, %c18_48, %c18_49], %16 {strides = array<i32>} : memref<4x20x20xf32, #tpu.memory_space<vmem>>, vector<4x2x2xf32>,
    return
  }
  func.func @transform_0(%arg0: i32) -> (i32, i32, i32) {
    %c0_i32 = arith.constant 0 : i32
    %c0_i32_0 = arith.constant 0 : i32
    %c0_i32_1 = arith.constant 0 : i32
    return %arg0, %c0_i32, %c0_i32_0 : i32, i32, i32
  }
  func.func @transform_1(%arg0: i32) -> (i32, i32, i32) {
    %c0_i32 = arith.constant 0 : i32
    %c0_i32_0 = arith.constant 0 : i32
    %c0_i32_1 = arith.constant 0 : i32
    return %arg0, %c0_i32, %c0_i32_0 : i32, i32, i32
  }
}

</mosaic_0001>

<bundles_post_ra>
// kernel: tpu_custom_call.1
= control target key start
LH: loop header
LB: loop body
LE: loop exit
PB: predicated region body
PF: predicated region fallthrough
CT: control target
= control target key end

     0   :  { %6 = vsyncpa [#allocation3], 0  ;;  %s920_s0 = inlined_call_operand.hbm [shape: f32[8,16,16], index: 0, kind: input, shape index: {}]   ;;  %s921_s1 = inlined_call_operand.vmem [shape: f32[8,20,20], index: 1, kind: output, shape index: {}]  }
   0x1   :  { %8 = vsyncpa [#allocation3 + $0x1], 0  ;;  %s649_s6 = smov 0   ;;  %s651_s7 = smov 0  }
   0x2   :  { %s653_s8 = smov 0   ;;  %s655_s9 = smov 0  }
   0x3 LB: > { %s507_s10 = sadd.s32 4294967295, %s632_s9   ;;  %s669_s11 = sadd.s32 1, %s632_s9   ;;  %s632_s9 = sphi %s655_s9, %s928_s9   ;;  %s628_s8 = sphi %s653_s8, %s927_s8   ;;  %s624_s7 = sphi %s651_s7, %s926_s7   ;;  %s620_s6 = sphi %s649_s6, %s925_s6  }
   0x4   : > { %s18_s12 = ssub.s32 %s632_s9, %s669_s11  ;;  %s21_s13 = sadd.s32 1, %s628_s8 }
   0x5   : > { %p19_p0 = scmp.eq.s32.totalorder %s18_s12, 0  ;;  %p28_p1 = scmp.ne.s32.totalorder %s628_s8, %s624_s7 }
   0x6   : > { %p29_p2 = scmp.eq.s32.totalorder %s632_s9, 0  ;;  %p34_p3 = scmp.ne.s32.totalorder %s624_s7, %s620_s6 }
   0x7   : > { %s679_s14 = scalar_select %p19_p0, %s628_s8, %s21_s13  }
   0x8   : > { %p681_p4 = por %p29_p2, %p28_p1  ;;  %p35_p5 = scmp.eq.s32.totalorder %s507_s10, 0 }
   0x9   : > { %p530_p6 = scmp.lt.s32.totalorder %s632_s9, 2  ;;  %s84_s17 = sand.u32 1, %s628_s8  }
   0xa   : > { %p688_p7 = por %p35_p5, %p34_p3  ;;  %s511_s18 = sshll.u32 %s84_s17, 6 }
   0xb   : > { %s522_s19 = sshll.u32 %s632_s9, 6  ;;  %s88_s23 = scalar_lea.vmem [#allocation2], %s511_s18 }
   0xc   : > { %s94_s22 = scalar_lea.hbm %s920_s0, %s522_s19  ;;  %s97_s24 = sshll.u32 %s88_s23, 4  ;;  %s98_s24 = int_to_ptr.vmem [resolvable:$true] %s97_s24 }
   0xd   : > { %s95_s25 = sshll.u32 %s94_s22, 4  ;;  %p699_p8 = pnand %p530_p6, %p681_p4  ;;  %s96_s25 = int_to_ptr.hbm [resolvable:$true] %s95_s25 }
   0xe   : > { %p515_p9 = scmp.ge.s32.totalorder %s632_s9, 1  ;;  %s85_s27 = scalar_lea.sflag [#allocation3], %s84_s17 }
   0xf   : > { %s568_s28 = sshra.s32 %s96_s25, 4  ;;  %p572_p11 = pneg %p699_p8  ;;  %s569_s28 = int_to_ptr.hbm [resolvable:$true] %s568_s28 }
  0x10   : > { %s570_s29 = scalar_lea.hbm %s569_s28, 64  ;;  %s575_s3 = scalar_lea.hbm %s920_s0, 128 }
  0x11   : > { %p571_p10 = scmp.ne.s32.totalorder %s569_s28, %s570_s29  ;;  %p576_p0 = scmp.lt.s32.totalorder %s569_s28, %s920_s0 }
  0x12   : > { %p577_p1 = scmp.lt.s32.totalorder %s575_s3, %s570_s29 }
  0x13   : > { %p573_p12 = pnand %p572_p11, %p571_p10 }
  0x14   : > { %p578_p2 = por %p577_p1, %p576_p0 }
  0x15   : > { %p574_p13 = pneg %p573_p12 }
  0x17   : > { %p579_p3 = pnand %p578_p2, %p574_p13 }
  0x19   : > { %582 = shalt.err (!%p579_p3)
}
  0x1a   : > { %s634_s6 = smov 128   ;;  %s635_s12 = smov 8  }
  0x1b   : > { %529 = dma.hbm_to_vmem [thread:$0]  (!%p699_p8), %s96_s25, 1024, %s98_s24, %s85_s27, %s634_s6, %s634_s6, %s635_s12  }
  0x1c   : > { %p105_p4 = scmp.lt.s32.totalorder %s632_s9, 3 }
  0x1e   : > { %p106_p5 = pnand %p515_p9, %p105_p4 }
  0x1f   : > { %s111_s13 = sand.u32 (!%p106_p5), 1, %s624_s7  }
  0x20   : > { %109 = sbr.rel (%p106_p5) target bundleno = 276 (0x114), region = 24  ;;  %s516_s15 = sshll.u32 (!%p106_p5), %s111_s13, 6 }
  0x21   : > { %s112_s17 = scalar_lea.sflag (!%p106_p5), [#allocation3], %s111_s13  ;;  %s718_s18 = scalar_lea.vmem (!%p106_p5), [#allocation2], %s516_s15 }
  0x25   : > { %615 = dma.done.wait (%p688_p7), %s112_s17, 1024  }
  0x26   : > { %617 = vsyncadd (%p688_p7), %s112_s17, 4294966272  ;;  %v144_v0 = vld [vmem:[%s718_s18] sm:$0xff]  ;;  %v146_v1 = vld [vmem:[%s718_s18 + $0x10] sm:$0xff]  ;;  %s636_s19 = smov 2   ;;  %s637_s16 = smov 114   ;;  %vm184_vm0 = vcmask 146448  }
  0x27   : > { %160 = vrot.lane.b32.xlu0 %v144_v0, %s636_s19  ;;  %164 = vrot.lane.b32.xlu1 %v146_v1, %s636_s19  ;;  %v148_v2 = vld [vmem:[%s718_s18 + $0x20] sm:$0xff]  ;;  %v145_v3 = vld [vmem:[%s718_s18 + $0x8] sm:$0xff]  ;;  %s638_s20 = smov 18   ;;  %s517_s21 = sshll.u32 %s507_s10, 2  ;;  %vm233_vm1 = vcmask 15360   ;;  %vm282_vm2 = vcmask 162960  }
  0x28   : > { %168 = vrot.lane.b32.xlu2 %v148_v2, %s636_s19  ;;  %v147_v4 = vld [vmem:[%s718_s18 + $0x18] sm:$0xff]  ;;  %v149_v5 = vld [vmem:[%s718_s18 + $0x28] sm:$0xff]  ;;  %v150_v6 = vld [vmem:[%s718_s18 + $0x30] sm:$0xff]  ;;  %p138_p6 = scmp.lt.s32.totalorder %s517_s21, 7  ;;  %vm311_vm3 = vcmask 140304   ;;  %vm336_vm4 = vcmask 9216  }
  0x29   : > { %v151_v7 = vld [vmem:[%s718_s18 + $0x38] sm:$0xff]  ;;  %v291_v8 = vld [vmem:[%s718_s18 + $0xe] sm:$0x3]  ;;  %v366_v16 = vld [vmem:[%s718_s18] sm:$0x3]  ;;  %vm361_vm5 = vcmask 156816  }
  0x2a   : > { %v292_v9 = vld [vmem:[%s718_s18 + $0x1e] sm:$0x3]  ;;  %v293_v10 = vld [vmem:[%s718_s18 + $0x2e] sm:$0x3]  ;;  %v367_v17 = vld [vmem:[%s718_s18 + $0x10] sm:$0x3] }
  0x2b   : > { %v294_v11 = vld [vmem:[%s718_s18 + $0x3e] sm:$0x3]  ;;  %v316_v12 = vld [vmem:[%s718_s18 + $0xe] sm:$0x3]  ;;  %v368_v18 = vld [vmem:[%s718_s18 + $0x20] sm:$0x3] }
  0x2c   : > { %v317_v13 = vld [vmem:[%s718_s18 + $0x1e] sm:$0x3]  ;;  %v318_v14 = vld [vmem:[%s718_s18 + $0x2e] sm:$0x3]  ;;  %v369_v19 = vld [vmem:[%s718_s18 + $0x30] sm:$0x3] }
  0x2d   : > { %v319_v15 = vld [vmem:[%s718_s18 + $0x3e] sm:$0x3]  ;;  %v390_v21 = vld [vmem:[%s718_s18] sm:$0x3]  ;;  %v391_v22 = vld [vmem:[%s718_s18 + $0x10] sm:$0x3] }
  0x2e   : > { %v392_v23 = vld [vmem:[%s718_s18 + $0x20] sm:$0x3]  ;;  %v393_v25 = vld [vmem:[%s718_s18 + $0x30] sm:$0x3]  ;;  %v341_v26 = vld [vmem:[%s718_s18 + $0xe] sm:$0x3] }
  0x2f   : > { %162 = vrot.lane.b32.xlu0 %v145_v3, %s636_s19  ;;  %166 = vrot.lane.b32.xlu1 %v147_v4, %s636_s19  ;;  %v414_v27 = vld [vmem:[%s718_s18] sm:$0x3]  ;;  %s930_s21 = smov (!%p138_p6, %s517_s21), 7  ;;  %v342_v29 = vld [vmem:[%s718_s18 + $0x1e] sm:$0x3] }
  0x30   : > { %170 = vrot.lane.b32.xlu2 %v149_v5, %s636_s19  ;;  %s523_s22 = smul.u32 24, %s930_s21  ;;  %v415_v30 = vld [vmem:[%s718_s18 + $0x10] sm:$0x3]  ;;  %v343_v31 = vld [vmem:[%s718_s18 + $0x2e] sm:$0x3] }
  0x31   : > { %v416_v35 = vld [vmem:[%s718_s18 + $0x20] sm:$0x3]  ;;  %v344_v36 = vld [vmem:[%s718_s18 + $0x3e] sm:$0x3]  ;;  %v417_v37 = vld [vmem:[%s718_s18 + $0x30] sm:$0x3] }
  0x32   : > { %s802_s23 = scalar_lea.vmem %s921_s1, %s523_s22 }
  0x37   : > { %172 = vrot.lane.b32.xlu0 %v150_v6, %s636_s19  ;;  %174 = vrot.lane.b32.xlu1 %v151_v7, %s636_s19 }
  0x38   : > { %209 = vrot.lane.b32.xlu2 %v144_v0, %s637_s16 }
  0x3f   : > { %211 = vrot.lane.b32.xlu0 %v145_v3, %s637_s16  ;;  %213 = vrot.lane.b32.xlu1 %v146_v1, %s637_s16 }
  0x40   : > { %215 = vrot.lane.b32.xlu2 %v147_v4, %s637_s16 }
  0x47   : > { %217 = vrot.lane.b32.xlu0 %v148_v2, %s637_s16  ;;  %219 = vrot.lane.b32.xlu1 %v149_v5, %s637_s16 }
  0x48   : > { %221 = vrot.lane.b32.xlu2 %v150_v6, %s637_s16 }
  0x4f   : > { %223 = vrot.lane.b32.xlu0 %v151_v7, %s637_s16  ;;  %258 = vrot.lane.b32.xlu1 %v144_v0, %s638_s20 }
  0x50   : > { %260 = vrot.lane.b32.xlu2 %v145_v3, %s638_s20 }
  0x57   : > { %262 = vrot.lane.b32.xlu0 %v146_v1, %s638_s20  ;;  %264 = vrot.lane.b32.xlu1 %v147_v4, %s638_s20 }
  0x58   : > { %266 = vrot.lane.b32.xlu2 %v148_v2, %s638_s20 }
  0x5f   : > { %268 = vrot.lane.b32.xlu0 %v149_v5, %s638_s20  ;;  %270 = vrot.lane.b32.xlu1 %v150_v6, %s638_s20 }
  0x60   : > { %272 = vrot.lane.b32.xlu2 %v151_v7, %s638_s20 }
  0x67   : > { %299 = vrot.lane.b32.xlu0 %v291_v8, %s636_s19  ;;  %301 = vrot.lane.b32.xlu1 %v292_v9, %s636_s19 }
  0x68   : > { %303 = vrot.lane.b32.xlu2 %v293_v10, %s636_s19 }
  0x6f   : > { %305 = vrot.lane.b32.xlu0 %v294_v11, %s636_s19  ;;  %324 = vrot.lane.b32.xlu1 %v316_v12, %s637_s16 }
  0x70   : > { %326 = vrot.lane.b32.xlu2 %v317_v13, %s637_s16 }
  0x77   : > { %328 = vrot.lane.b32.xlu0 %v318_v14, %s637_s16  ;;  %330 = vrot.lane.b32.xlu1 %v319_v15, %s637_s16 }
  0x78   : > { %374 = vrot.lane.b32.xlu2 %v366_v16, %s636_s19 }
  0x7f   : > { %376 = vrot.lane.b32.xlu0 %v367_v17, %s636_s19  ;;  %378 = vrot.lane.b32.xlu1 %v368_v18, %s636_s19 }
  0x80   : > { %380 = vrot.lane.b32.xlu2 %v369_v19, %s636_s19 }
  0x82   : > { %v169_v20 = vpop.permute.xlu2 %168 }
  0x83   : > { %189 = vst.msk [vmem:[%s802_s23 + $0x32] sm:$0xff] %vm184_vm0, %v169_v20 }
  0x87   : > { %398 = vrot.lane.b32.xlu0 %v390_v21, %s637_s16  ;;  %400 = vrot.lane.b32.xlu1 %v391_v22, %s637_s16 }
  0x88   : > { %402 = vrot.lane.b32.xlu2 %v392_v23, %s637_s16 }
  0x8a   : > { %v171_v24 = vpop.permute.xlu2 %170 }
  0x8b   : > { %190 = vst.msk [vmem:[%s802_s23 + $0x3a] sm:$0xff] %vm184_vm0, %v171_v24 }
  0x8f   : > { %404 = vrot.lane.b32.xlu0 %v393_v25, %s637_s16  ;;  %349 = vrot.lane.b32.xlu1 %v341_v26, %s638_s20 }
  0x90   : > { %422 = vrot.lane.b32.xlu2 %v414_v27, %s638_s20 }
  0x92   : > { %v210_v28 = vpop.permute.xlu2 %209 }
  0x97   : > { %351 = vrot.lane.b32.xlu0 %v342_v29, %s638_s20  ;;  %424 = vrot.lane.b32.xlu1 %v415_v30, %s638_s20 }
  0x98   : > { %353 = vrot.lane.b32.xlu2 %v343_v31, %s638_s20 }
  0x99   : > { %v161_v32 = vpop.permute.xlu0 %160  ;;  %v165_v33 = vpop.permute.xlu1 %164 }
  0x9a   : > { %185 = vst.msk [vmem:[%s802_s23 + $0x2] sm:$0xff] %vm184_vm0, %v161_v32  ;;  %v216_v34 = vpop.permute.xlu2 %215 }
  0x9b   : > { %187 = vst.msk [vmem:[%s802_s23 + $0x1a] sm:$0xff] %vm184_vm0, %v165_v33 }
  0x9c   : > { %234 = vst.msk [vmem:[%s802_s23 + $0x2] sm:$0xff] %vm233_vm1, %v210_v28 }
  0x9f   : > { %426 = vrot.lane.b32.xlu0 %v416_v35, %s638_s20  ;;  %355 = vrot.lane.b32.xlu1 %v344_v36, %s638_s20 }
  0xa0   : > { %428 = vrot.lane.b32.xlu2 %v417_v37, %s638_s20 }
  0xa1   : > { %v163_v38 = vpop.permute.xlu0 %162  ;;  %v167_v39 = vpop.permute.xlu1 %166 }
  0xa2   : > { %186 = vst.msk [vmem:[%s802_s23 + $0xa] sm:$0xff] %vm184_vm0, %v163_v38  ;;  %v222_v40 = vpop.permute.xlu2 %221 }
  0xa3   : > { %188 = vst.msk [vmem:[%s802_s23 + $0x22] sm:$0xff] %vm184_vm0, %v167_v39 }
  0xa4   : > { %237 = vst.msk [vmem:[%s802_s23 + $0x22] sm:$0xff] %vm233_vm1, %v216_v34 }
  0xa9   : > { %v173_v41 = vpop.permute.xlu0 %172  ;;  %v175_v42 = vpop.permute.xlu1 %174 }
  0xaa   : > { %191 = vst.msk [vmem:[%s802_s23 + $0x4a] sm:$0xff] %vm184_vm0, %v173_v41  ;;  %v261_v43 = vpop.permute.xlu2 %260 }
  0xab   : > { %192 = vst.msk [vmem:[%s802_s23 + $0x52] sm:$0xff] %vm184_vm0, %v175_v42 }
  0xac   : > { %240 = vst.msk [vmem:[%s802_s23 + $0x4a] sm:$0xff] %vm233_vm1, %v222_v40 }
  0xb1   : > { %v212_v44 = vpop.permute.xlu0 %211  ;;  %v214_v45 = vpop.permute.xlu1 %213 }
  0xb2   : > { %235 = vst.msk [vmem:[%s802_s23 + $0xa] sm:$0xff] %vm233_vm1, %v212_v44  ;;  %v267_v46 = vpop.permute.xlu2 %266 }
  0xb3   : > { %236 = vst.msk [vmem:[%s802_s23 + $0x1a] sm:$0xff] %vm233_vm1, %v214_v45 }
  0xb4   : > { %284 = vst.msk [vmem:[%s802_s23 + $0xa] sm:$0xff] %vm282_vm2, %v261_v43 }
  0xb9   : > { %v218_v47 = vpop.permute.xlu0 %217  ;;  %v220_v48 = vpop.permute.xlu1 %219 }
  0xba   : > { %238 = vst.msk [vmem:[%s802_s23 + $0x32] sm:$0xff] %vm233_vm1, %v218_v47  ;;  %v273_v49 = vpop.permute.xlu2 %272 }
  0xbb   : > { %239 = vst.msk [vmem:[%s802_s23 + $0x3a] sm:$0xff] %vm233_vm1, %v220_v48 }
  0xbc   : > { %287 = vst.msk [vmem:[%s802_s23 + $0x32] sm:$0xff] %vm282_vm2, %v267_v46 }
  0xc1   : > { %v224_v50 = vpop.permute.xlu0 %223  ;;  %v259_v51 = vpop.permute.xlu1 %258 }
  0xc2   : > { %241 = vst.msk [vmem:[%s802_s23 + $0x52] sm:$0xff] %vm233_vm1, %v224_v50  ;;  %v304_v52 = vpop.permute.xlu2 %303 }
  0xc3   : > { %283 = vst.msk [vmem:[%s802_s23 + $0x2] sm:$0xff] %vm282_vm2, %v259_v51 }
  0xc4   : > { %290 = vst.msk [vmem:[%s802_s23 + $0x52] sm:$0xff] %vm282_vm2, %v273_v49 }
  0xc5   : > { %314 = vst.msk [vmem:[%s802_s23 + $0x30] sm:$0x3] %vm311_vm3, %v304_v52 }
  0xc9   : > { %v263_v53 = vpop.permute.xlu0 %262  ;;  %v265_v54 = vpop.permute.xlu1 %264 }
  0xca   : > { %285 = vst.msk [vmem:[%s802_s23 + $0x1a] sm:$0xff] %vm282_vm2, %v263_v53  ;;  %v327_v55 = vpop.permute.xlu2 %326 }
  0xcb   : > { %286 = vst.msk [vmem:[%s802_s23 + $0x22] sm:$0xff] %vm282_vm2, %v265_v54 }
  0xd1   : > { %v269_v56 = vpop.permute.xlu0 %268  ;;  %v271_v57 = vpop.permute.xlu1 %270 }
  0xd2   : > { %288 = vst.msk [vmem:[%s802_s23 + $0x3a] sm:$0xff] %vm282_vm2, %v269_v56  ;;  %v375_v58 = vpop.permute.xlu2 %374 }
  0xd3   : > { %289 = vst.msk [vmem:[%s802_s23 + $0x4a] sm:$0xff] %vm282_vm2, %v271_v57 }
  0xd4   : > { %386 = vst.msk [vmem:[%s802_s23 + $0x12] sm:$0x3] %vm311_vm3, %v375_v58 }
  0xd9   : > { %v300_v59 = vpop.permute.xlu0 %299  ;;  %v302_v60 = vpop.permute.xlu1 %301 }
  0xda   : > { %312 = vst.msk [vmem:[%s802_s23] sm:$0x3] %vm311_vm3, %v300_v59  ;;  %v381_v63 = vpop.permute.xlu2 %380 }
  0xdb   : > { %313 = vst.msk [vmem:[%s802_s23 + $0x18] sm:$0x3] %vm311_vm3, %v302_v60 }
  0xdc   : > { %338 = vst.msk [vmem:[%s802_s23 + $0x18] sm:$0x3] %vm336_vm4, %v327_v55 }
  0xdd   : > { %389 = vst.msk [vmem:[%s802_s23 + $0x5a] sm:$0x3] %vm311_vm3, %v381_v63 }
  0xe1   : > { %v306_v61 = vpop.permute.xlu0 %305  ;;  %v325_v62 = vpop.permute.xlu1 %324 }
  0xe2   : > { %315 = vst.msk [vmem:[%s802_s23 + $0x48] sm:$0x3] %vm311_vm3, %v306_v61  ;;  %v403_v4 = vpop.permute.xlu2 %402 }
  0xe3   : > { %337 = vst.msk [vmem:[%s802_s23] sm:$0x3] %vm336_vm4, %v325_v62 }
  0xe9   : > { %v329_v0 = vpop.permute.xlu0 %328  ;;  %v331_v1 = vpop.permute.xlu1 %330 }
  0xea   : > { %339 = vst.msk [vmem:[%s802_s23 + $0x30] sm:$0x3] %vm336_vm4, %v329_v0  ;;  %v423_v7 = vpop.permute.xlu2 %422 }
  0xeb   : > { %340 = vst.msk [vmem:[%s802_s23 + $0x48] sm:$0x3] %vm336_vm4, %v331_v1 }
  0xf1   : > { %v377_v2 = vpop.permute.xlu0 %376  ;;  %v379_v3 = vpop.permute.xlu1 %378 }
  0xf2   : > { %387 = vst.msk [vmem:[%s802_s23 + $0x2a] sm:$0x3] %vm311_vm3, %v377_v2  ;;  %v354_v10 = vpop.permute.xlu2 %353 }
  0xf3   : > { %388 = vst.msk [vmem:[%s802_s23 + $0x42] sm:$0x3] %vm311_vm3, %v379_v3 }
  0xf4   : > { %412 = vst.msk [vmem:[%s802_s23 + $0x42] sm:$0x3] %vm336_vm4, %v403_v4 }
  0xf5   : > { %364 = vst.msk [vmem:[%s802_s23 + $0x30] sm:$0x3] %vm361_vm5, %v354_v10 }
  0xf9   : > { %v399_v5 = vpop.permute.xlu0 %398  ;;  %v401_v6 = vpop.permute.xlu1 %400 }
  0xfa   : > { %410 = vst.msk [vmem:[%s802_s23 + $0x12] sm:$0x3] %vm336_vm4, %v399_v5  ;;  %v429_v13 = vpop.permute.xlu2 %428 }
  0xfb   : > { %411 = vst.msk [vmem:[%s802_s23 + $0x2a] sm:$0x3] %vm336_vm4, %v401_v6 }
  0xfc   : > { %434 = vst.msk [vmem:[%s802_s23 + $0x12] sm:$0x3] %vm361_vm5, %v423_v7 }
 0x101   : > { %v405_v8 = vpop.permute.xlu0 %404  ;;  %v350_v9 = vpop.permute.xlu1 %349 }
 0x102   : > { %413 = vst.msk [vmem:[%s802_s23 + $0x5a] sm:$0x3] %vm336_vm4, %v405_v8 }
 0x103   : > { %362 = vst.msk [vmem:[%s802_s23] sm:$0x3] %vm361_vm5, %v350_v9 }
 0x104   : > { %437 = vst.msk [vmem:[%s802_s23 + $0x5a] sm:$0x3] %vm361_vm5, %v429_v13 }
 0x109   : > { %v352_v11 = vpop.permute.xlu0 %351  ;;  %v425_v12 = vpop.permute.xlu1 %424 }
 0x10a   : > { %363 = vst.msk [vmem:[%s802_s23 + $0x18] sm:$0x3] %vm361_vm5, %v352_v11 }
 0x10b   : > { %435 = vst.msk [vmem:[%s802_s23 + $0x2a] sm:$0x3] %vm361_vm5, %v425_v12 }
 0x111   : > { %v427_v14 = vpop.permute.xlu0 %426  ;;  %v356_v15 = vpop.permute.xlu1 %355 }
 0x112   : > { %436 = vst.msk [vmem:[%s802_s23 + $0x42] sm:$0x3] %vm361_vm5, %v427_v14 }
 0x113   : > { %365 = vst.msk [vmem:[%s802_s23 + $0x48] sm:$0x3] %vm361_vm5, %v356_v15 }
 0x114 PF: > { %p11_p7 = scmp.ge.s32.totalorder %s669_s11, 4   ;;  %s925_s6 = smov %s624_s7 }
 0x115   : > { %s926_s7 = smov %s628_s8  ;;  %s927_s8 = smov %s679_s14 }
 0x116   : > { %s928_s9 = smov %s669_s11  ;;  %13 = sbr.rel (!%p11_p7) target bundleno = 3 (0x3), region = 64 }
 0x11b   :  { %462 = vsyncpa [#allocation3], 1 }
 0x11c   :  { %464 = vsyncpa [#allocation3 + $0x1], 1 }

</bundles_post_ra>
